<compile_context>
chip_gen: v5e
topology: v5e:2x2
jax: 0.10.0
libtpu: 0.0.40
codegen_flags: <defaults>
</compile_context>

<pallas_src>
import functools

import jax
import jax.numpy as jnp
from jax import lax
from jax.experimental import pallas as pl
from jax.experimental.pallas import tpu as pltpu


def _round_up(x, m):
    return (x + m - 1) // m * m


def _default_compute_dtype():
    """bf16 transcendentals on v6e/v7x; f32 elsewhere (v5e has no bf16 EUP)."""
    try:
        kind = jax.devices()[0].device_kind.lower()
    except Exception:
        return jnp.float32
    if "v6" in kind or "v7" in kind:
        return jnp.bfloat16
    return jnp.float32


def _ua_kernel(w_ref, a_ref, c_ref, x_ref, o_ref, *, hidden_dim, compute_dtype):
    # w_ref: SMEM [1, H+1] = [0.5*theta2_0 .. 0.5*theta2_{H-1}, 0.5*sum(theta2)]
    # a_ref: VMEM [H, d, Tb] = broadcast of 0.5*theta1
    # c_ref: VMEM [H, d, Tb] = broadcast of 0.5*bias1
    # x_ref: VMEM [d, Tb]
    x = x_ref[...]  # [d, Tb], f32

    def body(h, acc):
        z = a_ref[h] * x + c_ref[h]                   # [d, Tb] FMA (VPU)
        t = jnp.tanh(z.astype(compute_dtype))         # one EUP push per elem
        return acc + w_ref[0, h] * t.astype(jnp.float32)

    acc = lax.fori_loop(0, hidden_dim, body,
                        jnp.zeros(x.shape, jnp.float32), unroll=True)
    # sigmoid(z) = 0.5*(1 + tanh(z/2)); the "+1" terms collapse to a constant
    # offset 0.5*sum(theta2), stored at w_ref[0, H].
    o_ref[...] = (acc + w_ref[0, hidden_dim]).astype(o_ref.dtype)


def universal_approximator_forward(x, theta1, bias1, theta2, *,
                                   t_block=512, compute_dtype=None):
    d, T = x.shape
    H = theta1.shape[0]
    if compute_dtype is None:
        compute_dtype = _default_compute_dtype()

    # Lane-aligned T tile; prefer >= 2 grid blocks (megacore / v7x) but never
    # below 128 lanes (unmasked lane-dense stores).
    tb = max(128, min(t_block, _round_up(max(T // 2, 1), 128)))
    Tp = _round_up(T, tb)
    xp = x if Tp == T else jnp.pad(x, ((0, 0), (0, Tp - T)))
    grid = (Tp // tb,)

    half = jnp.float32(0.5)
    th1 = theta1.astype(jnp.float32)
    b1 = bias1.astype(jnp.float32)
    th2 = theta2.astype(jnp.float32).reshape(1, H)
    # One-time pre-broadcast: d on sublanes, value replicated across Tb lanes.
    a = jnp.broadcast_to((half * th1)[:, :, None], (H, d, tb))
    c = jnp.broadcast_to((half * b1)[:, :, None], (H, d, tb))
    # SMEM scalars: 0.5*theta2 followed by the constant offset 0.5*sum(theta2).
    w = jnp.concatenate(
        [half * th2, half * jnp.sum(th2, axis=1, keepdims=True)], axis=1)  # [1, H+1]

    kernel = functools.partial(_ua_kernel, hidden_dim=H,
                               compute_dtype=compute_dtype)
    out = pl.pallas_call(
        kernel,
        out_shape=jax.ShapeDtypeStruct((d, Tp), x.dtype),
        grid=grid,
        in_specs=[
            pl.BlockSpec(memory_space=pltpu.MemorySpace.SMEM),   # w scalars
            pl.BlockSpec((H, d, tb), lambda i: (0, 0, 0)),       # a (constant block)
            pl.BlockSpec((H, d, tb), lambda i: (0, 0, 0)),       # c (constant block)
            pl.BlockSpec((d, tb), lambda i: (0, i)),             # x tile over T
        ],
        out_specs=pl.BlockSpec((d, tb), lambda i: (0, i)),
        compiler_params=pltpu.CompilerParams(
            dimension_semantics=("parallel",)),
    )(w, a, c, xp)
    return out if Tp == T else out[:, :T]


def _xavier_normal(key, shape, dtype=jnp.float32):
    # nn.init.xavier_normal_: std = sqrt(2 / (fan_in + fan_out)).
    fan_out, fan_in = shape
    std = (2.0 / (fan_in + fan_out)) ** 0.5
    return std * jax.random.normal(key, shape, dtype=dtype)


def _reference(x, theta1, bias1, theta2):
    s = jax.nn.sigmoid(theta1[:, :, None] * x[None, :, :] + bias1[:, :, None])
    return jnp.einsum('mh,hdt->mdt', theta2, s)[0]


if __name__ == "__main__":
    input_dim = 8     # d
    hidden_dim = 16   # H
    T = 256

    key = jax.random.PRNGKey(0)
    k1, k2, k3, kx = jax.random.split(key, 4)

    theta1 = _xavier_normal(k1, (hidden_dim, input_dim))
    bias1 = _xavier_normal(k2, (hidden_dim, input_dim))
    theta2 = _xavier_normal(k3, (1, hidden_dim))
    x = jax.random.normal(kx, (input_dim, T), dtype=jnp.float32)

    cdt = _default_compute_dtype()
    out = universal_approximator_forward(x, theta1, bias1, theta2,
                                         compute_dtype=cdt)
    out = jax.block_until_ready(out)

    ref = _reference(x, theta1, bias1, theta2)
    assert out.shape == (input_dim, T)
    if cdt == jnp.float32:
        atol = rtol = 1e-4
    else:  # bf16 transcendental path on v6e/v7x
        atol = rtol = 3e-2
    assert jnp.allclose(out, ref, atol=atol, rtol=rtol), "mismatch vs reference"

    print("KERNEL_OK")
</pallas_src>

<mosaic_0001>
module attributes {stable_mosaic.version = 11 : i64} {
  func.func @_ua_kernel(%arg0: i32, %arg1: memref<1x17xf32, #tpu.memory_space<smem>>, %arg2: memref<16x8x128xf32, #tpu.memory_space<vmem>>, %arg3: memref<16x8x128xf32, #tpu.memory_space<vmem>>, %arg4: memref<8x128xf32, #tpu.memory_space<vmem>>, %arg5: memref<8x128xf32, #tpu.memory_space<vmem>>) attributes {dimension_semantics = [#tpu.dimension_semantics<parallel>], iteration_bounds = array<i64: 2>, scalar_prefetch = 0 : i64, scratch_operands = 0 : i64, tpu.core_type = #tpu.core_type<tc>, window_params = [{transform_indices = @transform_0, window_bounds = array<i64: 1, 17>}, {pipeline_mode = #tpu.pipeline_mode<synchronous>, transform_indices = @transform_1, window_bounds = array<i64: 16, 8, 128>}, {pipeline_mode = #tpu.pipeline_mode<synchronous>, transform_indices = @transform_2, window_bounds = array<i64: 16, 8, 128>}, {transform_indices = @transform_3, window_bounds = array<i64: 8, 128>}, {transform_indices = @transform_4, window_bounds = array<i64: 8, 128>}]} {
    %c0 = arith.constant 0 : index
    %c0_0 = arith.constant 0 : index
    %0 = vector.load %arg4[%c0, %c0_0] : memref<8x128xf32, #tpu.memory_space<vmem>>, vector<8x128xf32>
    %cst = arith.constant 0.000000e+00 : f32
    %1 = vector.broadcast %cst : f32 to vector<8x128xf32>
    %c0_i32 = arith.constant 0 : i32
    %2 = arith.index_cast %c0_i32 : i32 to index
    %c0_1 = arith.constant 0 : index
    %c0_2 = arith.constant 0 : index
    %3 = vector.load %arg2[%2, %c0_1, %c0_2] : memref<16x8x128xf32, #tpu.memory_space<vmem>>, vector<1x8x128xf32>
    %4 = vector.shape_cast %3 : vector<1x8x128xf32> to vector<8x128xf32>
    %5 = arith.mulf %4, %0 : vector<8x128xf32>
    %6 = arith.index_cast %c0_i32 : i32 to index
    %c0_3 = arith.constant 0 : index
    %c0_4 = arith.constant 0 : index
    %7 = vector.load %arg3[%6, %c0_3, %c0_4] : memref<16x8x128xf32, #tpu.memory_space<vmem>>, vector<1x8x128xf32>
    %8 = vector.shape_cast %7 : vector<1x8x128xf32> to vector<8x128xf32>
    %9 = arith.addf %5, %8 : vector<8x128xf32>
    %10 = math.tanh %9 : vector<8x128xf32>
    %c0_5 = arith.constant 0 : index
    %11 = arith.index_cast %c0_i32 : i32 to index
    %12 = memref.load %arg1[%c0_5, %11] : memref<1x17xf32, #tpu.memory_space<smem>>
    %13 = vector.broadcast %12 : f32 to vector<8x128xf32>
    %14 = arith.mulf %13, %10 : vector<8x128xf32>
    %15 = arith.addf %1, %14 : vector<8x128xf32>
    %c1_i32 = arith.constant 1 : i32
    %16 = arith.index_cast %c1_i32 : i32 to index
    %c0_6 = arith.constant 0 : index
    %c0_7 = arith.constant 0 : index
    %17 = vector.load %arg2[%16, %c0_6, %c0_7] : memref<16x8x128xf32, #tpu.memory_space<vmem>>, vector<1x8x128xf32>
    %18 = vector.shape_cast %17 : vector<1x8x128xf32> to vector<8x128xf32>
    %19 = arith.mulf %18, %0 : vector<8x128xf32>
    %20 = arith.index_cast %c1_i32 : i32 to index
    %c0_8 = arith.constant 0 : index
    %c0_9 = arith.constant 0 : index
    %21 = vector.load %arg3[%20, %c0_8, %c0_9] : memref<16x8x128xf32, #tpu.memory_space<vmem>>, vector<1x8x128xf32>
    %22 = vector.shape_cast %21 : vector<1x8x128xf32> to vector<8x128xf32>
    %23 = arith.addf %19, %22 : vector<8x128xf32>
    %24 = math.tanh %23 : vector<8x128xf32>
    %c0_10 = arith.constant 0 : index
    %25 = arith.index_cast %c1_i32 : i32 to index
    %26 = memref.load %arg1[%c0_10, %25] : memref<1x17xf32, #tpu.memory_space<smem>>
    %27 = vector.broadcast %26 : f32 to vector<8x128xf32>
    %28 = arith.mulf %27, %24 : vector<8x128xf32>
    %29 = arith.addf %15, %28 : vector<8x128xf32>
    %c2_i32 = arith.constant 2 : i32
    %30 = arith.index_cast %c2_i32 : i32 to index
    %c0_11 = arith.constant 0 : index
    %c0_12 = arith.constant 0 : index
    %31 = vector.load %arg2[%30, %c0_11, %c0_12] : memref<16x8x128xf32, #tpu.memory_space<vmem>>, vector<1x8x128xf32>
    %32 = vector.shape_cast %31 : vector<1x8x128xf32> to vector<8x128xf32>
    %33 = arith.mulf %32, %0 : vector<8x128xf32>
    %34 = arith.index_cast %c2_i32 : i32 to index
    %c0_13 = arith.constant 0 : index
    %c0_14 = arith.constant 0 : index
    %35 = vector.load %arg3[%34, %c0_13, %c0_14] : memref<16x8x128xf32, #tpu.memory_space<vmem>>, vector<1x8x128xf32>
    %36 = vector.shape_cast %35 : vector<1x8x128xf32> to vector<8x128xf32>
    %37 = arith.addf %33, %36 : vector<8x128xf32>
    %38 = math.tanh %37 : vector<8x128xf32>
    %c0_15 = arith.constant 0 : index
    %39 = arith.index_cast %c2_i32 : i32 to index
    %40 = memref.load %arg1[%c0_15, %39] : memref<1x17xf32, #tpu.memory_space<smem>>
    %41 = vector.broadcast %40 : f32 to vector<8x128xf32>
    %42 = arith.mulf %41, %38 : vector<8x128xf32>
    %43 = arith.addf %29, %42 : vector<8x128xf32>
    %c3_i32 = arith.constant 3 : i32
    %44 = arith.index_cast %c3_i32 : i32 to index
    %c0_16 = arith.constant 0 : index
    %c0_17 = arith.constant 0 : index
    %45 = vector.load %arg2[%44, %c0_16, %c0_17] : memref<16x8x128xf32, #tpu.memory_space<vmem>>, vector<1x8x128xf32>
    %46 = vector.shape_cast %45 : vector<1x8x128xf32> to vector<8x128xf32>
    %47 = arith.mulf %46, %0 : vector<8x128xf32>
    %48 = arith.index_cast %c3_i32 : i32 to index
    %c0_18 = arith.constant 0 : index
    %c0_19 = arith.constant 0 : index
    %49 = vector.load %arg3[%48, %c0_18, %c0_19] : memref<16x8x128xf32, #tpu.memory_space<vmem>>, vector<1x8x128xf32>
    %50 = vector.shape_cast %49 : vector<1x8x128xf32> to vector<8x128xf32>
    %51 = arith.addf %47, %50 : vector<8x128xf32>
    %52 = math.tanh %51 : vector<8x128xf32>
    %c0_20 = arith.constant 0 : index
    %53 = arith.index_cast %c3_i32 : i32 to index
    %54 = memref.load %arg1[%c0_20, %53] : memref<1x17xf32, #tpu.memory_space<smem>>
    %55 = vector.broadcast %54 : f32 to vector<8x128xf32>
    %56 = arith.mulf %55, %52 : vector<8x128xf32>
    %57 = arith.addf %43, %56 : vector<8x128xf32>
    %c4_i32 = arith.constant 4 : i32
    %58 = arith.index_cast %c4_i32 : i32 to index
    %c0_21 = arith.constant 0 : index
    %c0_22 = arith.constant 0 : index
    %59 = vector.load %arg2[%58, %c0_21, %c0_22] : memref<16x8x128xf32, #tpu.memory_space<vmem>>, vector<1x8x128xf32>
    %60 = vector.shape_cast %59 : vector<1x8x128xf32> to vector<8x128xf32>
    %61 = arith.mulf %60, %0 : vector<8x128xf32>
    %62 = arith.index_cast %c4_i32 : i32 to index
    %c0_23 = arith.constant 0 : index
    %c0_24 = arith.constant 0 : index
    %63 = vector.load %arg3[%62, %c0_23, %c0_24] : memref<16x8x128xf32, #tpu.memory_space<vmem>>, vector<1x8x128xf32>
    %64 = vector.shape_cast %63 : vector<1x8x128xf32> to vector<8x128xf32>
    %65 = arith.addf %61, %64 : vector<8x128xf32>
    %66 = math.tanh %65 : vector<8x128xf32>
    %c0_25 = arith.constant 0 : index
    %67 = arith.index_cast %c4_i32 : i32 to index
    %68 = memref.load %arg1[%c0_25, %67] : memref<1x17xf32, #tpu.memory_space<smem>>
    %69 = vector.broadcast %68 : f32 to vector<8x128xf32>
    %70 = arith.mulf %69, %66 : vector<8x128xf32>
    %71 = arith.addf %57, %70 : vector<8x128xf32>
    %c5_i32 = arith.constant 5 : i32
    %72 = arith.index_cast %c5_i32 : i32 to index
    %c0_26 = arith.constant 0 : index
    %c0_27 = arith.constant 0 : index
    %73 = vector.load %arg2[%72, %c0_26, %c0_27] : memref<16x8x128xf32, #tpu.memory_space<vmem>>, vector<1x8x128xf32>
    %74 = vector.shape_cast %73 : vector<1x8x128xf32> to vector<8x128xf32>
    %75 = arith.mulf %74, %0 : vector<8x128xf32>
    %76 = arith.index_cast %c5_i32 : i32 to index
    %c0_28 = arith.constant 0 : index
    %c0_29 = arith.constant 0 : index
    %77 = vector.load %arg3[%76, %c0_28, %c0_29] : memref<16x8x128xf32, #tpu.memory_space<vmem>>, vector<1x8x128xf32>
    %78 = vector.shape_cast %77 : vector<1x8x128xf32> to vector<8x128xf32>
    %79 = arith.addf %75, %78 : vector<8x128xf32>
    %80 = math.tanh %79 : vector<8x128xf32>
    %c0_30 = arith.constant 0 : index
    %81 = arith.index_cast %c5_i32 : i32 to index
    %82 = memref.load %arg1[%c0_30, %81] : memref<1x17xf32, #tpu.memory_space<smem>>
    %83 = vector.broadcast %82 : f32 to vector<8x128xf32>
    %84 = arith.mulf %83, %80 : vector<8x128xf32>
    %85 = arith.addf %71, %84 : vector<8x128xf32>
    %c6_i32 = arith.constant 6 : i32
    %86 = arith.index_cast %c6_i32 : i32 to index
    %c0_31 = arith.constant 0 : index
    %c0_32 = arith.constant 0 : index
    %87 = vector.load %arg2[%86, %c0_31, %c0_32] : memref<16x8x128xf32, #tpu.memory_space<vmem>>, vector<1x8x128xf32>
    %88 = vector.shape_cast %87 : vector<1x8x128xf32> to vector<8x128xf32>
    %89 = arith.mulf %88, %0 : vector<8x128xf32>
    %90 = arith.index_cast %c6_i32 : i32 to index
    %c0_33 = arith.constant 0 : index
    %c0_34 = arith.constant 0 : index
    %91 = vector.load %arg3[%90, %c0_33, %c0_34] : memref<16x8x128xf32, #tpu.memory_space<vmem>>, vector<1x8x128xf32>
    %92 = vector.shape_cast %91 : vector<1x8x128xf32> to vector<8x128xf32>
    %93 = arith.addf %89, %92 : vector<8x128xf32>
    %94 = math.tanh %93 : vector<8x128xf32>
    %c0_35 = arith.constant 0 : index
    %95 = arith.index_cast %c6_i32 : i32 to index
    %96 = memref.load %arg1[%c0_35, %95] : memref<1x17xf32, #tpu.memory_space<smem>>
    %97 = vector.broadcast %96 : f32 to vector<8x128xf32>
    %98 = arith.mulf %97, %94 : vector<8x128xf32>
    %99 = arith.addf %85, %98 : vector<8x128xf32>
    %c7_i32 = arith.constant 7 : i32
    %100 = arith.index_cast %c7_i32 : i32 to index
    %c0_36 = arith.constant 0 : index
    %c0_37 = arith.constant 0 : index
    %101 = vector.load %arg2[%100, %c0_36, %c0_37] : memref<16x8x128xf32, #tpu.memory_space<vmem>>, vector<1x8x128xf32>
    %102 = vector.shape_cast %101 : vector<1x8x128xf32> to vector<8x128xf32>
    %103 = arith.mulf %102, %0 : vector<8x128xf32>
    %104 = arith.index_cast %c7_i32 : i32 to index
    %c0_38 = arith.constant 0 : index
    %c0_39 = arith.constant 0 : index
    %105 = vector.load %arg3[%104, %c0_38, %c0_39] : memref<16x8x128xf32, #tpu.memory_space<vmem>>, vector<1x8x128xf32>
    %106 = vector.shape_cast %105 : vector<1x8x128xf32> to vector<8x128xf32>
    %107 = arith.addf %103, %106 : vector<8x128xf32>
    %108 = math.tanh %107 : vector<8x128xf32>
    %c0_40 = arith.constant 0 : index
    %109 = arith.index_cast %c7_i32 : i32 to index
    %110 = memref.load %arg1[%c0_40, %109] : memref<1x17xf32, #tpu.memory_space<smem>>
    %111 = vector.broadcast %110 : f32 to vector<8x128xf32>
    %112 = arith.mulf %111, %108 : vector<8x128xf32>
    %113 = arith.addf %99, %112 : vector<8x128xf32>
    %c8_i32 = arith.constant 8 : i32
    %114 = arith.index_cast %c8_i32 : i32 to index
    %c0_41 = arith.constant 0 : index
    %c0_42 = arith.constant 0 : index
    %115 = vector.load %arg2[%114, %c0_41, %c0_42] : memref<16x8x128xf32, #tpu.memory_space<vmem>>, vector<1x8x128xf32>
    %116 = vector.shape_cast %115 : vector<1x8x128xf32> to vector<8x128xf32>
    %117 = arith.mulf %116, %0 : vector<8x128xf32>
    %118 = arith.index_cast %c8_i32 : i32 to index
    %c0_43 = arith.constant 0 : index
    %c0_44 = arith.constant 0 : index
    %119 = vector.load %arg3[%118, %c0_43, %c0_44] : memref<16x8x128xf32, #tpu.memory_space<vmem>>, vector<1x8x128xf32>
    %120 = vector.shape_cast %119 : vector<1x8x128xf32> to vector<8x128xf32>
    %121 = arith.addf %117, %120 : vector<8x128xf32>
    %122 = math.tanh %121 : vector<8x128xf32>
    %c0_45 = arith.constant 0 : index
    %123 = arith.index_cast %c8_i32 : i32 to index
    %124 = memref.load %arg1[%c0_45, %123] : memref<1x17xf32, #tpu.memory_space<smem>>
    %125 = vector.broadcast %124 : f32 to vector<8x128xf32>
    %126 = arith.mulf %125, %122 : vector<8x128xf32>
    %127 = arith.addf %113, %126 : vector<8x128xf32>
    %c9_i32 = arith.constant 9 : i32
    %128 = arith.index_cast %c9_i32 : i32 to index
    %c0_46 = arith.constant 0 : index
    %c0_47 = arith.constant 0 : index
    %129 = vector.load %arg2[%128, %c0_46, %c0_47] : memref<16x8x128xf32, #tpu.memory_space<vmem>>, vector<1x8x128xf32>
    %130 = vector.shape_cast %129 : vector<1x8x128xf32> to vector<8x128xf32>
    %131 = arith.mulf %130, %0 : vector<8x128xf32>
    %132 = arith.index_cast %c9_i32 : i32 to index
    %c0_48 = arith.constant 0 : index
    %c0_49 = arith.constant 0 : index
    %133 = vector.load %arg3[%132, %c0_48, %c0_49] : memref<16x8x128xf32, #tpu.memory_space<vmem>>, vector<1x8x128xf32>
    %134 = vector.shape_cast %133 : vector<1x8x128xf32> to vector<8x128xf32>
    %135 = arith.addf %131, %134 : vector<8x128xf32>
    %136 = math.tanh %135 : vector<8x128xf32>
    %c0_50 = arith.constant 0 : index
    %137 = arith.index_cast %c9_i32 : i32 to index
    %138 = memref.load %arg1[%c0_50, %137] : memref<1x17xf32, #tpu.memory_space<smem>>
    %139 = vector.broadcast %138 : f32 to vector<8x128xf32>
    %140 = arith.mulf %139, %136 : vector<8x128xf32>
    %141 = arith.addf %127, %140 : vector<8x128xf32>
    %c10_i32 = arith.constant 10 : i32
    %142 = arith.index_cast %c10_i32 : i32 to index
    %c0_51 = arith.constant 0 : index
    %c0_52 = arith.constant 0 : index
    %143 = vector.load %arg2[%142, %c0_51, %c0_52] : memref<16x8x128xf32, #tpu.memory_space<vmem>>, vector<1x8x128xf32>
    %144 = vector.shape_cast %143 : vector<1x8x128xf32> to vector<8x128xf32>
    %145 = arith.mulf %144, %0 : vector<8x128xf32>
    %146 = arith.index_cast %c10_i32 : i32 to index
    %c0_53 = arith.constant 0 : index
    %c0_54 = arith.constant 0 : index
    %147 = vector.load %arg3[%146, %c0_53, %c0_54] : memref<16x8x128xf32, #tpu.memory_space<vmem>>, vector<1x8x128xf32>
    %148 = vector.shape_cast %147 : vector<1x8x128xf32> to vector<8x128xf32>
    %149 = arith.addf %145, %148 : vector<8x128xf32>
    %150 = math.tanh %149 : vector<8x128xf32>
    %c0_55 = arith.constant 0 : index
    %151 = arith.index_cast %c10_i32 : i32 to index
    %152 = memref.load %arg1[%c0_55, %151] : memref<1x17xf32, #tpu.memory_space<smem>>
    %153 = vector.broadcast %152 : f32 to vector<8x128xf32>
    %154 = arith.mulf %153, %150 : vector<8x128xf32>
    %155 = arith.addf %141, %154 : vector<8x128xf32>
    %c11_i32 = arith.constant 11 : i32
    %156 = arith.index_cast %c11_i32 : i32 to index
    %c0_56 = arith.constant 0 : index
    %c0_57 = arith.constant 0 : index
    %157 = vector.load %arg2[%156, %c0_56, %c0_57] : memref<16x8x128xf32, #tpu.memory_space<vmem>>, vector<1x8x128xf32>
    %158 = vector.shape_cast %157 : vector<1x8x128xf32> to vector<8x128xf32>
    %159 = arith.mulf %158, %0 : vector<8x128xf32>
    %160 = arith.index_cast %c11_i32 : i32 to index
    %c0_58 = arith.constant 0 : index
    %c0_59 = arith.constant 0 : index
    %161 = vector.load %arg3[%160, %c0_58, %c0_59] : memref<16x8x128xf32, #tpu.memory_space<vmem>>, vector<1x8x128xf32>
    %162 = vector.shape_cast %161 : vector<1x8x128xf32> to vector<8x128xf32>
    %163 = arith.addf %159, %162 : vector<8x128xf32>
    %164 = math.tanh %163 : vector<8x128xf32>
    %c0_60 = arith.constant 0 : index
    %165 = arith.index_cast %c11_i32 : i32 to index
    %166 = memref.load %arg1[%c0_60, %165] : memref<1x17xf32, #tpu.memory_space<smem>>
    %167 = vector.broadcast %166 : f32 to vector<8x128xf32>
    %168 = arith.mulf %167, %164 : vector<8x128xf32>
    %169 = arith.addf %155, %168 : vector<8x128xf32>
    %c12_i32 = arith.constant 12 : i32
    %170 = arith.index_cast %c12_i32 : i32 to index
    %c0_61 = arith.constant 0 : index
    %c0_62 = arith.constant 0 : index
    %171 = vector.load %arg2[%170, %c0_61, %c0_62] : memref<16x8x128xf32, #tpu.memory_space<vmem>>, vector<1x8x128xf32>
    %172 = vector.shape_cast %171 : vector<1x8x128xf32> to vector<8x128xf32>
    %173 = arith.mulf %172, %0 : vector<8x128xf32>
    %174 = arith.index_cast %c12_i32 : i32 to index
    %c0_63 = arith.constant 0 : index
    %c0_64 = arith.constant 0 : index
    %175 = vector.load %arg3[%174, %c0_63, %c0_64] : memref<16x8x128xf32, #tpu.memory_space<vmem>>, vector<1x8x128xf32>
    %176 = vector.shape_cast %175 : vector<1x8x128xf32> to vector<8x128xf32>
    %177 = arith.addf %173, %176 : vector<8x128xf32>
    %178 = math.tanh %177 : vector<8x128xf32>
    %c0_65 = arith.constant 0 : index
    %179 = arith.index_cast %c12_i32 : i32 to index
    %180 = memref.load %arg1[%c0_65, %179] : memref<1x17xf32, #tpu.memory_space<smem>>
    %181 = vector.broadcast %180 : f32 to vector<8x128xf32>
    %182 = arith.mulf %181, %178 : vector<8x128xf32>
    %183 = arith.addf %169, %182 : vector<8x128xf32>
    %c13_i32 = arith.constant 13 : i32
    %184 = arith.index_cast %c13_i32 : i32 to index
    %c0_66 = arith.constant 0 : index
    %c0_67 = arith.constant 0 : index
    %185 = vector.load %arg2[%184, %c0_66, %c0_67] : memref<16x8x128xf32, #tpu.memory_space<vmem>>, vector<1x8x128xf32>
    %186 = vector.shape_cast %185 : vector<1x8x128xf32> to vector<8x128xf32>
    %187 = arith.mulf %186, %0 : vector<8x128xf32>
    %188 = arith.index_cast %c13_i32 : i32 to index
    %c0_68 = arith.constant 0 : index
    %c0_69 = arith.constant 0 : index
    %189 = vector.load %arg3[%188, %c0_68, %c0_69] : memref<16x8x128xf32, #tpu.memory_space<vmem>>, vector<1x8x128xf32>
    %190 = vector.shape_cast %189 : vector<1x8x128xf32> to vector<8x128xf32>
    %191 = arith.addf %187, %190 : vector<8x128xf32>
    %192 = math.tanh %191 : vector<8x128xf32>
    %c0_70 = arith.constant 0 : index
    %193 = arith.index_cast %c13_i32 : i32 to index
    %194 = memref.load %arg1[%c0_70, %193] : memref<1x17xf32, #tpu.memory_space<smem>>
    %195 = vector.broadcast %194 : f32 to vector<8x128xf32>
    %196 = arith.mulf %195, %192 : vector<8x128xf32>
    %197 = arith.addf %183, %196 : vector<8x128xf32>
    %c14_i32 = arith.constant 14 : i32
    %198 = arith.index_cast %c14_i32 : i32 to index
    %c0_71 = arith.constant 0 : index
    %c0_72 = arith.constant 0 : index
    %199 = vector.load %arg2[%198, %c0_71, %c0_72] : memref<16x8x128xf32, #tpu.memory_space<vmem>>, vector<1x8x128xf32>
    %200 = vector.shape_cast %199 : vector<1x8x128xf32> to vector<8x128xf32>
    %201 = arith.mulf %200, %0 : vector<8x128xf32>
    %202 = arith.index_cast %c14_i32 : i32 to index
    %c0_73 = arith.constant 0 : index
    %c0_74 = arith.constant 0 : index
    %203 = vector.load %arg3[%202, %c0_73, %c0_74] : memref<16x8x128xf32, #tpu.memory_space<vmem>>, vector<1x8x128xf32>
    %204 = vector.shape_cast %203 : vector<1x8x128xf32> to vector<8x128xf32>
    %205 = arith.addf %201, %204 : vector<8x128xf32>
    %206 = math.tanh %205 : vector<8x128xf32>
    %c0_75 = arith.constant 0 : index
    %207 = arith.index_cast %c14_i32 : i32 to index
    %208 = memref.load %arg1[%c0_75, %207] : memref<1x17xf32, #tpu.memory_space<smem>>
    %209 = vector.broadcast %208 : f32 to vector<8x128xf32>
    %210 = arith.mulf %209, %206 : vector<8x128xf32>
    %211 = arith.addf %197, %210 : vector<8x128xf32>
    %c15_i32 = arith.constant 15 : i32
    %212 = arith.index_cast %c15_i32 : i32 to index
    %c0_76 = arith.constant 0 : index
    %c0_77 = arith.constant 0 : index
    %213 = vector.load %arg2[%212, %c0_76, %c0_77] : memref<16x8x128xf32, #tpu.memory_space<vmem>>, vector<1x8x128xf32>
    %214 = vector.shape_cast %213 : vector<1x8x128xf32> to vector<8x128xf32>
    %215 = arith.mulf %214, %0 : vector<8x128xf32>
    %216 = arith.index_cast %c15_i32 : i32 to index
    %c0_78 = arith.constant 0 : index
    %c0_79 = arith.constant 0 : index
    %217 = vector.load %arg3[%216, %c0_78, %c0_79] : memref<16x8x128xf32, #tpu.memory_space<vmem>>, vector<1x8x128xf32>
    %218 = vector.shape_cast %217 : vector<1x8x128xf32> to vector<8x128xf32>
    %219 = arith.addf %215, %218 : vector<8x128xf32>
    %220 = math.tanh %219 : vector<8x128xf32>
    %c0_80 = arith.constant 0 : index
    %221 = arith.index_cast %c15_i32 : i32 to index
    %222 = memref.load %arg1[%c0_80, %221] : memref<1x17xf32, #tpu.memory_space<smem>>
    %223 = vector.broadcast %222 : f32 to vector<8x128xf32>
    %224 = arith.mulf %223, %220 : vector<8x128xf32>
    %225 = arith.addf %211, %224 : vector<8x128xf32>
    %c16_i32 = arith.constant 16 : i32
    %c0_81 = arith.constant 0 : index
    %c16 = arith.constant 16 : index
    %226 = memref.load %arg1[%c0_81, %c16] : memref<1x17xf32, #tpu.memory_space<smem>>
    %227 = vector.broadcast %226 : f32 to vector<8x128xf32>
    %228 = arith.addf %225, %227 : vector<8x128xf32>
    %c0_82 = arith.constant 0 : index
    %c0_83 = arith.constant 0 : index
    %229 = vector.load %arg5[%c0_82, %c0_83] : memref<8x128xf32, #tpu.memory_space<vmem>>, vector<8x128xf32>
    tpu.vector_store %arg5[%c0_82, %c0_83], %228 {strides = array<i32>} : memref<8x128xf32, #tpu.memory_space<vmem>>, vector<8x128xf32>,
    return
  }
  func.func @transform_0(%arg0: i32) -> (i32, i32) {
    %c0_i32 = arith.constant 0 : i32
    %c0_i32_0 = arith.constant 0 : i32
    %c0_i32_1 = arith.constant 0 : i32
    return %c0_i32, %c0_i32_0 : i32, i32
  }
  func.func @transform_1(%arg0: i32) -> (i32, i32, i32) {
    %c0_i32 = arith.constant 0 : i32
    %c0_i32_0 = arith.constant 0 : i32
    %c0_i32_1 = arith.constant 0 : i32
    %c0_i32_2 = arith.constant 0 : i32
    return %c0_i32, %c0_i32_0, %c0_i32_1 : i32, i32, i32
  }
  func.func @transform_2(%arg0: i32) -> (i32, i32, i32) {
    %c0_i32 = arith.constant 0 : i32
    %c0_i32_0 = arith.constant 0 : i32
    %c0_i32_1 = arith.constant 0 : i32
    %c0_i32_2 = arith.constant 0 : i32
    return %c0_i32, %c0_i32_0, %c0_i32_1 : i32, i32, i32
  }
  func.func @transform_3(%arg0: i32) -> (i32, i32) {
    %c0_i32 = arith.constant 0 : i32
    %c0_i32_0 = arith.constant 0 : i32
    return %c0_i32, %arg0 : i32, i32
  }
  func.func @transform_4(%arg0: i32) -> (i32, i32) {
    %c0_i32 = arith.constant 0 : i32
    %c0_i32_0 = arith.constant 0 : i32
    return %c0_i32, %arg0 : i32, i32
  }
}

</mosaic_0001>

<bundles_post_ra>
// kernel: tpu_custom_call.1
= control target key start
LH: loop header
LB: loop body
LE: loop exit
PB: predicated region body
PF: predicated region fallthrough
CT: control target
= control target key end

     0   :  { %9 = vsyncpa [#allocation5], 0  ;;  %s1136_s0 = inlined_call_operand.hbm [shape: f32[1,17], index: 0, kind: input, shape index: {}]   ;;  %s1137_s1 = inlined_call_operand.hbm [shape: f32[16,8,128], index: 1, kind: input, shape index: {}]   ;;  %s1138_s2 = inlined_call_operand.hbm [shape: f32[16,8,128], index: 2, kind: input, shape index: {}]   ;;  %s1139_s3 = inlined_call_operand.hbm [shape: f32[8,256], index: 3, kind: input, shape index: {}]   ;;  %s1140_s4 = inlined_call_operand.hbm [shape: f32[8,256], index: 4, kind: output, shape index: {}]  }
   0x1   :  { %10 = vsyncpa [#allocation3], 0 }
   0x2   :  { %11 = vsyncpa [#allocation8], 0 }
   0x3   :  { %12 = vsyncpa [#allocation4], 0 }
   0x4   :  { %14 = vsyncpa [#allocation4 + $0x1], 0  ;;  %s916_s15 = smov 0   ;;  %s918_s16 = smov 0  }
   0x5   :  { %s920_s17 = smov 0   ;;  %s922_s18 = smov 0  }
   0x6 LB: > { %s161_s21 = sshll.u32 %s1137_s1, 4  ;;  %s940_s22 = sadd.s32 4294967295, %s884_s18   ;;  %s884_s18 = sphi %s922_s18, %s1151_s18   ;;  %s880_s17 = sphi %s920_s17, %s1150_s17   ;;  %s876_s16 = sphi %s918_s16, %s1149_s16   ;;  %s872_s15 = sphi %s916_s15, %s1148_s15   ;;  %s162_s21 = int_to_ptr.hbm [resolvable:$true] %s161_s21 }
   0x7   : > { %p557_p0 = scmp.ge.s32.totalorder %s884_s18, 1  ;;  %p104_p1 = scmp.eq.s32.totalorder %s940_s22, 0 }
   0x8   : > { %p127_p2 = scmp.eq.s32.totalorder %s940_s22, 1  ;;  %p140_p3 = scmp.lt.s32.totalorder %s884_s18, 3 }
   0x9   : > { %s886_s24 = smov [#allocation6]   ;;  %s152_s28 = sshll.u32 %s1136_s0, 4  ;;  %s153_s28 = int_to_ptr.hbm [resolvable:$true] %s152_s28 }
   0xa   : > { %p946_p4 = pnand %p557_p0, %p140_p3  ;;  %s163_s25 = sshll.u32 %s886_s24, 4  ;;  %s164_s25 = int_to_ptr.vmem [resolvable:$true] %s163_s25 }
   0xb   : > { %s175_s5 = sshll.u32 %s1138_s2, 4  ;;  %s887_s6 = smov 128   ;;  %s176_s5 = int_to_ptr.hbm [resolvable:$true] %s175_s5 }
   0xc   : > { %p606_p5 = pneg %p946_p4  ;;  %s888_s7 = smov 8  }
   0xd   : > { %s889_s8 = smov [#allocation2]   ;;  %s890_s9 = smov [#allocation7]  }
   0xe   : > { %p607_p7 = pnand %p606_p5, %p104_p1  ;;  %s177_s10 = sshll.u32 %s890_s9, 4  ;;  %s178_s10 = int_to_ptr.vmem [resolvable:$true] %s177_s10 }
   0xf   : > { %s556_s11 = sadd.s32 4294967294, %s884_s18   ;;  %s963_s12 = sadd.s32 1, %s884_s18  }
  0x10   : > { %612 = dma.hbm_to_vmem [thread:$0]  (!%p607_p7), %s162_s21, 2048, %s164_s25, [#allocation3], %s887_s6, %s887_s6, %s888_s7  }
  0x11   : > { %609 = dma.hbm_to_smem (!%p607_p7), %s153_s28, 16, %s889_s8, [#allocation5]  }
  0x12   : > { %615 = dma.hbm_to_vmem [thread:$0]  (!%p607_p7), %s176_s5, 2048, %s178_s10, [#allocation8], %s887_s6, %s887_s6, %s888_s7  }
  0x13   : > { %s87_s13 = ssub.s32 %s884_s18, %s963_s12  ;;  %s90_s14 = sadd.s32 1, %s880_s17 }
  0x14   : > { %p88_p8 = scmp.eq.s32.totalorder %s87_s13, 0  ;;  %p97_p9 = scmp.ne.s32.totalorder %s880_s17, %s876_s16 }
  0x15   : > { %p98_p10 = scmp.eq.s32.totalorder %s884_s18, 0  ;;  %p103_p11 = scmp.ne.s32.totalorder %s876_s16, %s872_s15 }
  0x16   : > { %s974_s19 = scalar_select %p88_p8, %s880_s17, %s90_s14  }
  0x17   : > { %p976_p12 = por %p98_p10, %p97_p9  ;;  %p982_p13 = por %p104_p1, %p103_p11 }
  0x18   : > { %p988_p0 = por %p127_p2, %p97_p9  ;;  %p133_p3 = scmp.eq.s32.totalorder %s556_s11, 1 }
  0x19   : > { %p627_p5 = scmp.lt.s32.totalorder %s884_s18, 2  ;;  %s191_s25 = sand.u32 1, %s884_s18  }
  0x1a   : > { %p994_p7 = por %p133_p3, %p103_p11  ;;  %s193_s27 = sand.u32 1, %s880_s17  }
  0x1b   : > { %s563_s28 = sshll.u32 %s884_s18, 3  ;;  %s562_s29 = sshll.u32 %s193_s27, 3 }
  0x1c   : > { %s199_s6 = scalar_lea.hbm %s1139_s3, %s563_s28  ;;  %s195_s8 = scalar_lea.vmem [#allocation9], %s562_s29 }
  0x1d   : > { %s201_s7 = sshll.u32 %s199_s6, 4  ;;  %s203_s9 = sshll.u32 %s195_s8, 4  ;;  %s202_s7 = int_to_ptr.hbm [resolvable:$true] %s201_s7  ;;  %s204_s9 = int_to_ptr.vmem [resolvable:$true] %s203_s9 }
  0x1e   : > { %p1005_p2 = pnand %p627_p5, %p976_p12  ;;  %s192_s11 = scalar_lea.sflag [#allocation3], %s191_s25 }
  0x1f   : > { %s776_s13 = sshra.s32 %s202_s7, 4  ;;  %s783_s29 = scalar_lea.hbm %s1139_s3, 16  ;;  %s777_s13 = int_to_ptr.hbm [resolvable:$true] %s776_s13 }
  0x20   : > { %s778_s14 = scalar_lea.hbm %s777_s13, 8  ;;  %p780_p9 = pneg %p1005_p2 }
  0x21   : > { %p779_p8 = scmp.ne.s32.totalorder %s777_s13, %s778_s14  ;;  %p784_p12 = scmp.lt.s32.totalorder %s777_s13, %s1139_s3 }
  0x22   : > { %p785_p3 = scmp.lt.s32.totalorder %s783_s29, %s778_s14 }
  0x23   : > { %p781_p10 = pnand %p780_p9, %p779_p8 }
  0x24   : > { %p786_p5 = por %p785_p3, %p784_p12 }
  0x25   : > { %p782_p11 = pneg %p781_p10 }
  0x27   : > { %p787_p6 = pnand %p786_p5, %p782_p11 }
  0x29   : > { %790 = shalt.err (!%p787_p6)
}
  0x2a   : > { %619 = dma.hbm_to_vmem [thread:$0]  (!%p1005_p2), %s202_s7, 128, %s204_s9, %s192_s11  }
  0x2b   : > { %212 = sbr.rel (%p946_p4) target bundleno = 110 (0x6e), region = 36 }
  0x30   : > { %851 = dma.done.wait (%p104_p1), [#allocation5], 16  }
  0x31   : > { %853 = vsyncadd (%p104_p1), [#allocation5], 4294967280 }
  0x32   : > { %855 = dma.done.wait (%p104_p1), [#allocation3], 2048  }
  0x33   : > { %857 = vsyncadd (%p104_p1), [#allocation3], 4294965248 }
  0x34   : > { %859 = dma.done.wait (%p104_p1), [#allocation8], 2048  }
  0x35   : > { %861 = vsyncadd (%p104_p1), [#allocation8], 4294965248  ;;  %s229_s23 = sand.u32 1, %s940_s22   ;;  %s231_s25 = sand.u32 1, %s876_s16  }
  0x36   : > { %s1037_s5 = sshll.u32 %s231_s25, 3  ;;  %s230_s6 = scalar_lea.sflag [#allocation3], %s229_s23 }
  0x37   : > { %s233_s7 = scalar_lea.vmem [#allocation9], %s1037_s5 }
  0x38   : > { %863 = dma.done.wait (%p982_p13), %s230_s6, 128  }
  0x39   : > { %865 = vsyncadd (%p982_p13), %s230_s6, 4294967168 }
  0x3a   : > { %239 = sfence }
  0x3b   : > { %v1044_v0 = vld [vmem:[%s233_s7] sm:$0xff]  ;;  %s1046_s8 = sld [smem:[#allocation2]]  ;;  %v282_v6 = vld [vmem:[#allocation6 + $0x10] sm:$0xff]  ;;  %v293_v10 = vld [vmem:[#allocation6 + $0x18] sm:$0xff] }
  0x3c   : > { %v261_v1 = vld [vmem:[#allocation6] sm:$0xff]  ;;  %v271_v4 = vld [vmem:[#allocation6 + $0x8] sm:$0xff]  ;;  %s1049_s9 = sld [smem:[#allocation2 + $0x1]]  ;;  %v283_v8 = vmul.f32 %v282_v6, %v1044_v0  ;;  %v285_v9 = vld [vmem:[#allocation7 + $0x10] sm:$0xff]  ;;  %v294_v13 = vmul.f32 %v293_v10, %v1044_v0 }
  0x3d   : > { %v263_v2 = vld [vmem:[#allocation7] sm:$0xff]  ;;  %v262_v3 = vmul.f32 %v261_v1, %v1044_v0  ;;  %v274_v5 = vld [vmem:[#allocation7 + $0x8] sm:$0xff]  ;;  %v272_v7 = vmul.f32 %v271_v4, %v1044_v0  ;;  %s1053_s21 = sld [smem:[#allocation2 + $0x2]]  ;;  %v296_v11 = vld [vmem:[#allocation7 + $0x18] sm:$0xff] }
  0x3e   : > { %s1056_s10 = sld [smem:[#allocation2 + $0x3]]  ;;  %v304_v14 = vld [vmem:[#allocation6 + $0x20] sm:$0xff]  ;;  %v315_v16 = vld [vmem:[#allocation6 + $0x28] sm:$0xff]  ;;  %v286_v18 = vadd.f32 %v285_v9, %v283_v8  ;;  %v326_v22 = vld [vmem:[#allocation6 + $0x30] sm:$0xff]  ;;  %v297_v23 = vadd.f32 %v296_v11, %v294_v13 }
  0x3f   : > { %v264_v12 = vadd.f32 %v263_v2, %v262_v3  ;;  %v307_v15 = vld [vmem:[#allocation7 + $0x20] sm:$0xff]  ;;  %v275_v17 = vadd.f32 %v274_v5, %v272_v7  ;;  %v305_v19 = vmul.f32 %v304_v14, %v1044_v0  ;;  %v316_v20 = vmul.f32 %v315_v16, %v1044_v0  ;;  %v318_v21 = vld [vmem:[#allocation7 + $0x28] sm:$0xff]  ;;  %s1060_s11 = sld [smem:[#allocation2 + $0x4]]  ;;  %v329_v25 = vld [vmem:[#allocation7 + $0x30] sm:$0xff] }
  0x40   : > { %v327_v24 = vmul.f32 %v326_v22, %v1044_v0  ;;  %v337_v26 = vld [vmem:[#allocation6 + $0x38] sm:$0xff]  ;;  %v348_v27 = vld [vmem:[#allocation6 + $0x40] sm:$0xff]  ;;  %v359_v32 = vld [vmem:[#allocation6 + $0x48] sm:$0xff]  ;;  %s1064_s13 = sld [smem:[#allocation2 + $0x5]] }
  0x41   : > { %669 = vtanh.f32 %v264_v12  ;;  %v308_v28 = vadd.f32 %v307_v15, %v305_v19  ;;  %v319_v29 = vadd.f32 %v318_v21, %v316_v20  ;;  %v338_v30 = vmul.f32 %v337_v26, %v1044_v0  ;;  %v340_v31 = vld [vmem:[#allocation7 + $0x38] sm:$0xff]  ;;  %v351_v36 = vld [vmem:[#allocation7 + $0x40] sm:$0xff]  ;;  %v370_v37 = vld [vmem:[#allocation6 + $0x50] sm:$0xff]  ;;  %s1069_s14 = sld [smem:[#allocation2 + $0x6]] }
  0x42   : > { %671 = vtanh.f32 %v275_v17  ;;  %v330_v33 = vadd.f32 %v329_v25, %v327_v24  ;;  %v349_v34 = vmul.f32 %v348_v27, %v1044_v0  ;;  %v267_v35 = vstv %s1046_s8  ;;  %v362_v44 = vld [vmem:[#allocation7 + $0x48] sm:$0xff]  ;;  %v381_v45 = vld [vmem:[#allocation6 + $0x58] sm:$0xff]  ;;  %s1074_s27 = sld [smem:[#allocation2 + $0x7]]  ;;  %v373_v53 = vld [vmem:[#allocation7 + $0x50] sm:$0xff] }
  0x43   : > { %673 = vtanh.f32 %v286_v18  ;;  %v278_v38 = vstv %s1049_s9  ;;  %v341_v39 = vadd.f32 %v340_v31, %v338_v30  ;;  %v360_v40 = vmul.f32 %v359_v32, %v1044_v0  ;;  %v392_v54 = vld [vmem:[#allocation6 + $0x60] sm:$0xff]  ;;  %s1078_s28 = sld [smem:[#allocation2 + $0x8]]  ;;  %v384_v62 = vld [vmem:[#allocation7 + $0x58] sm:$0xff]  ;;  %v403_v63 = vld [vmem:[#allocation6 + $0x68] sm:$0xff] }
  0x44   : > { %675 = vtanh.f32 %v297_v23  ;;  %v289_v42 = vstv %s1053_s21  ;;  %v300_v43 = vstv %s1056_s10  ;;  %v352_v48 = vadd.f32 %v351_v36, %v349_v34  ;;  %s1082_s29 = sld [smem:[#allocation2 + $0x9]]  ;;  %v395_v7 = vld [vmem:[#allocation7 + $0x60] sm:$0xff]  ;;  %v414_v8 = vld [vmem:[#allocation6 + $0x70] sm:$0xff]  ;;  %v406_v15 = vld [vmem:[#allocation7 + $0x68] sm:$0xff]  ;;  %s587_s21 = sshll.u32 %s940_s22, 3 }
  0x45   : > { %677 = vtanh.f32 %v308_v28  ;;  %v371_v49 = vmul.f32 %v370_v37, %v1044_v0  ;;  %v311_v52 = vstv %s1060_s11  ;;  %v363_v57 = vadd.f32 %v362_v44, %v360_v40  ;;  %s1086_s30 = sld [smem:[#allocation2 + $0xa]]  ;;  %v425_v16 = vld [vmem:[#allocation6 + $0x78] sm:$0xff]  ;;  %v417_v23 = vld [vmem:[#allocation7 + $0x70] sm:$0xff]  ;;  %s440_s22 = scalar_lea.sflag [#allocation4], %s231_s25 }
  0x46   : > { %679 = vtanh.f32 %v319_v29  ;;  %v382_v58 = vmul.f32 %v381_v45, %v1044_v0  ;;  %v322_v2 = vstv %s1064_s13  ;;  %v393_v4 = vmul.f32 %v392_v54, %v1044_v0  ;;  %s1090_s20 = sld [smem:[#allocation2 + $0xb]]  ;;  %v428_v30 = vld [vmem:[#allocation7 + $0x78] sm:$0xff]  ;;  %s450_s13 = scalar_lea.hbm %s1140_s4, %s587_s21 }
  0x47   : > { %v670_v41 = vpop.eup %669  ;;  %681 = vtanh.f32 %v330_v33  ;;  %v374_v3 = vadd.f32 %v373_v53, %v371_v49  ;;  %v333_v10 = vstv %s1069_s14  ;;  %v404_v12 = vmul.f32 %v403_v63, %v1044_v0  ;;  %s1094_s23 = sld [smem:[#allocation2 + $0xc]]  ;;  %s259_s14 = scalar_lea.vmem [#allocation10], %s1037_s5 }
  0x48   : > { %v672_v46 = vpop.eup %671  ;;  %v268_v47 = vmul.f32 %v670_v41, %v267_v35  ;;  %683 = vtanh.f32 %v341_v39  ;;  %v385_v11 = vadd.f32 %v384_v62, %v382_v58  ;;  %v344_v18 = vstv %s1074_s27  ;;  %s582_s6 = sld [smem:[#allocation2 + $0xd]]  ;;  %s452_s27 = sshll.u32 %s259_s14, 4  ;;  %s453_s27 = int_to_ptr.vmem [resolvable:$true] %s452_s27 }
  0x49   : > { %v674_v50 = vpop.eup %673  ;;  %v279_v51 = vmul.f32 %v672_v46, %v278_v38  ;;  %685 = vtanh.f32 %v352_v48  ;;  %v396_v19 = vadd.f32 %v395_v7, %v393_v4  ;;  %v415_v20 = vmul.f32 %v414_v8, %v1044_v0  ;;  %s583_s7 = sld [smem:[#allocation2 + $0xe]]  ;;  %s826_s5 = scalar_lea.hbm %s1140_s4, 16 }
  0x4a   : > { %v676_v55 = vpop.eup %675  ;;  %v290_v56 = vmul.f32 %v674_v50, %v289_v42  ;;  %687 = vtanh.f32 %v363_v57  ;;  %v355_v25 = vstv %s1078_s28  ;;  %v407_v26 = vadd.f32 %v406_v15, %v404_v12  ;;  %s584_s8 = sld [smem:[#allocation2 + $0xf]]  ;;  %s454_s28 = sshll.u32 %s450_s13, 4  ;;  %s455_s28 = int_to_ptr.hbm [resolvable:$true] %s454_s28 }
  0x4b   : > { %v678_v59 = vpop.eup %677  ;;  %v280_v60 = vadd.f32 %v279_v51, %v268_v47  ;;  %v301_v61 = vmul.f32 %v676_v55, %v300_v43  ;;  %689 = vtanh.f32 %v374_v3  ;;  %v426_v27 = vmul.f32 %v425_v16, %v1044_v0  ;;  %s585_s9 = sld [smem:[#allocation2 + $0x10]] }
  0x4c   : > { %v680_v1 = vpop.eup %679  ;;  %v312_v6 = vmul.f32 %v678_v59, %v311_v52  ;;  %691 = vtanh.f32 %v385_v11  ;;  %v366_v32 = vstv %s1082_s29  ;;  %v418_v33 = vadd.f32 %v417_v23, %v415_v20  ;;  %s820_s29 = sshra.s32 %s455_s28, 4  ;;  %s821_s29 = int_to_ptr.hbm [resolvable:$true] %s820_s29 }
  0x4d   : > { %v291_v5 = vadd.f32 %v290_v56, %v280_v60  ;;  %v682_v9 = vpop.eup %681  ;;  %v323_v14 = vmul.f32 %v680_v1, %v322_v2  ;;  %693 = vtanh.f32 %v396_v19  ;;  %v377_v37 = vstv %s1086_s30  ;;  %s822_s30 = scalar_lea.hbm %s821_s29, 8  ;;  %p827_p13 = scmp.lt.s32.totalorder %s821_s29, %s1140_s4 }
  0x4e   : > { %v684_v17 = vpop.eup %683  ;;  %v334_v22 = vmul.f32 %v682_v9, %v333_v10  ;;  %695 = vtanh.f32 %v407_v26  ;;  %v429_v38 = vadd.f32 %v428_v30, %v426_v27  ;;  %v388_v41 = vstv %s1090_s20  ;;  %p823_p1 = scmp.ne.s32.totalorder %s821_s29, %s822_s30  ;;  %p828_p2 = scmp.lt.s32.totalorder %s826_s5, %s822_s30 }
  0x4f   : > { %v302_v13 = vadd.f32 %v301_v61, %v291_v5  ;;  %v686_v24 = vpop.eup %685  ;;  %v345_v29 = vmul.f32 %v684_v17, %v344_v18  ;;  %697 = vtanh.f32 %v418_v33  ;;  %v399_v45 = vstv %s1094_s23 }
  0x50   : > { %v688_v31 = vpop.eup %687  ;;  %v356_v35 = vmul.f32 %v686_v24, %v355_v25  ;;  %699 = vtanh.f32 %v429_v38  ;;  %v410_v49 = vstv %s582_s6  ;;  %v421_v53 = vstv %s583_s7  ;;  %p824_p4 = pnand %p823_p1, %p988_p0  ;;  %p829_p8 = por %p828_p2, %p827_p13 }
  0x51   : > { %v313_v21 = vadd.f32 %v312_v6, %v302_v13  ;;  %v690_v36 = vpop.eup %689  ;;  %v367_v40 = vmul.f32 %v688_v31, %v366_v32  ;;  %v432_v57 = vstv %s584_s8  ;;  %v436_v63 = vstv %s585_s9 }
  0x52   : > { %v692_v0 = vpop.eup %691  ;;  %v378_v43 = vmul.f32 %v690_v36, %v377_v37  ;;  %p825_p6 = pneg %p824_p4 }
  0x53   : > { %v324_v28 = vadd.f32 %v323_v14, %v313_v21  ;;  %v694_v44 = vpop.eup %693  ;;  %v389_v47 = vmul.f32 %v692_v0, %v388_v41 }
  0x54   : > { %v696_v48 = vpop.eup %695  ;;  %v400_v51 = vmul.f32 %v694_v44, %v399_v45  ;;  %p830_p9 = pnand %p829_p8, %p825_p6 }
  0x55   : > { %v335_v34 = vadd.f32 %v334_v22, %v324_v28  ;;  %v698_v52 = vpop.eup %697  ;;  %v411_v55 = vmul.f32 %v696_v48, %v410_v49 }
  0x56   : > { %v700_v56 = vpop.eup %699  ;;  %v422_v59 = vmul.f32 %v698_v52, %v421_v53 }
  0x57   : > { %v346_v39 = vadd.f32 %v345_v29, %v335_v34  ;;  %v433_v61 = vmul.f32 %v700_v56, %v432_v57 }
  0x59   : > { %v357_v42 = vadd.f32 %v356_v35, %v346_v39 }
  0x5b   : > { %v368_v46 = vadd.f32 %v367_v40, %v357_v42 }
  0x5d   : > { %v379_v50 = vadd.f32 %v378_v43, %v368_v46 }
  0x5f   : > { %v390_v54 = vadd.f32 %v389_v47, %v379_v50 }
  0x61   : > { %v401_v58 = vadd.f32 %v400_v51, %v390_v54 }
  0x63   : > { %v412_v60 = vadd.f32 %v411_v55, %v401_v58 }
  0x65   : > { %v423_v62 = vadd.f32 %v422_v59, %v412_v60 }
  0x67   : > { %v434_v1 = vadd.f32 %v433_v61, %v423_v62 }
  0x69   : > { %v437_v2 = vadd.f32 %v436_v63, %v434_v1 }
  0x6b   : > { %438 = vst [vmem:[%s259_s14] sm:$0xff] %v437_v2 }
  0x6c   : > { %833 = shalt.err (!%p830_p9)
}
  0x6d   : > { %604 = dma.vmem_to_hbm [thread:$0]  (%p988_p0), %s453_s27, 128, %s455_s28, %s440_s22  }
  0x6e PF: > { %s466_s25 = sand.u32 1, %s872_s15   ;;  %p1147_p10 = scmp.ge.s32.totalorder %s884_s18, 2 }
  0x6f   : > { %s467_s8 = scalar_lea.sflag [#allocation4], %s466_s25 }
  0x70   : > { %p621_p11 = pnand %p1147_p10, %p994_p7 }
  0x72   : > { %p622_p12 = pneg %p621_p11 }
  0x74   : > { %867 = dma.done.wait (%p622_p12), %s467_s8, 128  }
  0x75   : > { %869 = vsyncadd (%p622_p12), %s467_s8, 4294967168  ;;  %p17_p3 = scmp.ge.s32.totalorder %s963_s12, 4   ;;  %s1148_s15 = smov %s876_s16 }
  0x76   : > { %s1149_s16 = smov %s880_s17  ;;  %s1150_s17 = smov %s974_s19 }
  0x77   : > { %s1151_s18 = smov %s963_s12  ;;  %19 = sbr.rel (!%p17_p3) target bundleno = 6 (0x6), region = 123 }
  0x7c   :  { %473 = vsyncpa [#allocation3], 1 }
  0x7d   :  { %475 = vsyncpa [#allocation3 + $0x1], 1 }
  0x7e   :  { %476 = vsyncpa [#allocation8], 1 }
  0x7f   :  { %477 = vsyncpa [#allocation4], 1 }
  0x80   :  { %479 = vsyncpa [#allocation4 + $0x1], 1 }
  0x81   :  { %480 = vsyncpa [#allocation5], 1 }
  0x82   :  { %482 = vsyncpa [#allocation5 + $0x1], 1 }

</bundles_post_ra>
